<compile_context>
chip_gen: v7x
topology: tpu7x:2x2x1
jax: 0.10.0
libtpu: 0.0.40
codegen_flags: <defaults>
</compile_context>

<pallas_src>
import jax
import jax.numpy as jnp
from jax.experimental import pallas as pl
from jax.experimental.pallas import tpu as pltpu

LN_EPS = 1e-5  # PyTorch nn.LayerNorm default


def maskblock_kernel(feat_ref, mask_ref,
                     w1_ref, w2_ref, w3_ref,   # (mask->agg), (agg->in), (in->hid)
                     pvec_ref,                 # packed [b1; b2; b3; gamma; beta]
                     out_ref):
    agg_dim = w1_ref.shape[1]
    input_dim = w2_ref.shape[1]
    hidden_dim = w3_ref.shape[1]
    inv_hidden = 1.0 / hidden_dim  # baked constant; avoids per-row divides

    # Packed per-feature parameters (always f32). Rows: b1, b2, b3, gamma, beta.
    b1 = pvec_ref[0:1, 0:agg_dim]
    b2 = pvec_ref[1:2, 0:input_dim]
    b3 = pvec_ref[2:3, 0:hidden_dim]
    gamma = pvec_ref[3:4, 0:hidden_dim]
    beta = pvec_ref[4:5, 0:hidden_dim]

    # --- mask generator: Linear -> ReLU -> Linear (MXU, f32 accumulation) ---
    h1 = jnp.dot(mask_ref[...], w1_ref[...],
                 preferred_element_type=jnp.float32) + b1
    h1 = jnp.maximum(h1, 0.0)
    weights = jnp.dot(h1.astype(w2_ref.dtype), w2_ref[...],
                      preferred_element_type=jnp.float32) + b2

    # --- elementwise gating of the feature embedding (VPU, f32) ---
    weighted = feat_ref[...].astype(jnp.float32) * weights

    # --- ffn: Linear -> LayerNorm -> ReLU ---
    h = jnp.dot(weighted.astype(w3_ref.dtype), w3_ref[...],
                preferred_element_type=jnp.float32) + b3

    # Fused single-pass LayerNorm stats: var = E[h^2] - mean^2 (biased, eps=1e-5).
    s1 = jnp.sum(h, axis=-1, keepdims=True)
    s2 = jnp.sum(h * h, axis=-1, keepdims=True)
    mean = s1 * inv_hidden
    var = s2 * inv_hidden - mean * mean
    normed = (h - mean) * jax.lax.rsqrt(var + LN_EPS)
    out_ref[...] = jnp.maximum(normed * gamma + beta, 0.0).astype(out_ref.dtype)


def _pack_param_vectors(params, agg_dim, input_dim, hidden_dim):
    """Pack b1/b2/b3/gamma/beta into a single zero-padded (5, P) f32 array."""
    p = max(agg_dim, input_dim, hidden_dim)
    pvec = jnp.zeros((5, p), jnp.float32)
    pvec = pvec.at[0, :agg_dim].set(params["b1"].reshape(-1).astype(jnp.float32))
    pvec = pvec.at[1, :input_dim].set(params["b2"].reshape(-1).astype(jnp.float32))
    pvec = pvec.at[2, :hidden_dim].set(params["b3"].reshape(-1).astype(jnp.float32))
    pvec = pvec.at[3, :hidden_dim].set(params["gamma"].reshape(-1).astype(jnp.float32))
    pvec = pvec.at[4, :hidden_dim].set(params["beta"].reshape(-1).astype(jnp.float32))
    return pvec


def mask_block(feature_input, mask_input, params, *, batch_tile=None, interpret=False):
    """Run MaskBlock forward via a Pallas TPU kernel.

    feature_input: [B, input_dim]       (f32 or bf16)
    mask_input:    [B, mask_input_dim]  (f32 or bf16)
    params: dict of weights (stored (in, out)) and f32 biases / LN affine.
    """
    B, input_dim = feature_input.shape
    B2, mask_dim = mask_input.shape
    assert B == B2
    agg_dim = params["w1"].shape[1]
    hidden_dim = params["w3"].shape[1]
    out_dtype = feature_input.dtype

    # --- batch tile: multiple of 8, divides B, and (if possible) >= 2 grid
    # steps so the pipeline double-buffers and both v7x TensorCores get work.
    if batch_tile is None:
        batch_tile = B
        for cand in (1024, 512, 256, 128, 64, 32, 16, 8):
            if B % cand == 0 and B // cand >= 2:
                batch_tile = cand
                break
    assert B % batch_tile == 0, "batch_tile must divide the batch size"
    assert batch_tile == B or batch_tile % 8 == 0, (
        "batch_tile must be a multiple of 8 (sublane tiling) or equal to batch")

    # --- VMEM budget: double-buffered activation tiles (lane-padded) plus the
    # resident weights, with 2x headroom; capped below v7x's 64 MiB physical.
    pad128 = lambda d: -(-d // 128) * 128
    w_bytes = sum(int(params[k].size) * params[k].dtype.itemsize
                  for k in ("w1", "w2", "w3"))

    def est_bytes(tile):
        act = 2 * tile * (pad128(input_dim) * feature_input.dtype.itemsize
                          + pad128(mask_dim) * mask_input.dtype.itemsize
                          + pad128(hidden_dim) * out_dtype.itemsize)
        return 2 * act + w_bytes + (4 << 20)

    VMEM_BUDGET = 48 << 20  # headroom under v7x's 64 MiB VMEM
    while est_bytes(batch_tile) > VMEM_BUDGET and batch_tile % 16 == 0 and batch_tile > 8:
        batch_tile //= 2
    vmem_limit = int(min(max(est_bytes(batch_tile), 16 << 20), VMEM_BUDGET))

    grid = (B // batch_tile,)
    pvec = _pack_param_vectors(params, agg_dim, input_dim, hidden_dim)

    def batched(d):
        return pl.BlockSpec((batch_tile, d), lambda i: (i, 0))

    def full(shape):
        return pl.BlockSpec(shape, lambda i: (0,) * len(shape))

    out = pl.pallas_call(
        maskblock_kernel,
        out_shape=jax.ShapeDtypeStruct((B, hidden_dim), out_dtype),
        grid_spec=pltpu.PrefetchScalarGridSpec(
            num_scalar_prefetch=0,
            grid=grid,
            in_specs=[
                batched(input_dim),                # feature_input
                batched(mask_dim),                 # mask_input
                full((mask_dim, agg_dim)),         # w1
                full((agg_dim, input_dim)),        # w2
                full((input_dim, hidden_dim)),     # w3
                full(pvec.shape),                  # packed b1/b2/b3/gamma/beta
            ],
            out_specs=batched(hidden_dim),
        ),
        compiler_params=pltpu.CompilerParams(
            dimension_semantics=("parallel",),
            vmem_limit_bytes=vmem_limit,
        ),
        interpret=interpret,
    )(feature_input, mask_input,
      params["w1"], params["w2"], params["w3"], pvec)
    return out


def init_params(key, input_dim, mask_input_dim, hidden_dim,
                reduction_ratio=1.0, dtype=jnp.float32):
    """Deterministic synthetic parameters (shapes follow MaskBlock.__init__).

    Weight matrices stored (in, out) — transpose of nn.Linear.weight — and cast
    to `dtype` (bf16 recommended on v6e/v7x). Biases / LayerNorm affine stay f32.
    """
    agg_dim = int(input_dim * reduction_ratio)
    ks = jax.random.split(key, 6)
    scale = 0.1
    return {
        "w1": (scale * jax.random.normal(ks[0], (mask_input_dim, agg_dim), jnp.float32)).astype(dtype),
        "b1": scale * jax.random.normal(ks[1], (1, agg_dim), jnp.float32),
        "w2": (scale * jax.random.normal(ks[2], (agg_dim, input_dim), jnp.float32)).astype(dtype),
        "b2": scale * jax.random.normal(ks[3], (1, input_dim), jnp.float32),
        "w3": (scale * jax.random.normal(ks[4], (input_dim, hidden_dim), jnp.float32)).astype(dtype),
        "b3": scale * jax.random.normal(ks[5], (1, hidden_dim), jnp.float32),
        # nn.LayerNorm default init: gamma=1, beta=0
        "gamma": jnp.ones((1, hidden_dim), jnp.float32),
        "beta": jnp.zeros((1, hidden_dim), jnp.float32),
    }


def mask_block_ref(feature_input, mask_input, params):
    """Pure-JAX f32 reference matching the PyTorch forward."""
    f32 = jnp.float32
    x = feature_input.astype(f32)
    m = mask_input.astype(f32)
    w1 = params["w1"].astype(f32)
    w2 = params["w2"].astype(f32)
    w3 = params["w3"].astype(f32)
    h1 = jnp.maximum(m @ w1 + params["b1"], 0.0)
    weights = h1 @ w2 + params["b2"]
    weighted = x * weights
    h = weighted @ w3 + params["b3"]
    mean = jnp.mean(h, axis=-1, keepdims=True)
    var = jnp.mean((h - mean) ** 2, axis=-1, keepdims=True)
    normed = (h - mean) / jnp.sqrt(var + LN_EPS)
    return jnp.maximum(normed * params["gamma"] + params["beta"], 0.0)


if __name__ == "__main__":
    # Small shapes consistent with the module's forward:
    #   feature_input: [batch, input_dim], mask_input: [batch, mask_input_dim]
    batch, input_dim, mask_input_dim, hidden_dim = 1024, 32, 16, 32
    key = jax.random.PRNGKey(0)
    k_feat, k_mask, k_par = jax.random.split(key, 3)

    feat32 = jax.random.normal(k_feat, (batch, input_dim), jnp.float32)
    mask32 = jax.random.normal(k_mask, (batch, mask_input_dim), jnp.float32)

    # --- f32 path (strict numerical check). batch_tile=128 -> grid=(8,). ---
    params32 = init_params(k_par, input_dim, mask_input_dim, hidden_dim,
                           reduction_ratio=1.0, dtype=jnp.float32)
    out32 = jax.block_until_ready(
        mask_block(feat32, mask32, params32, batch_tile=128))
    ref32 = mask_block_ref(feat32, mask32, params32)
    assert out32.shape == (batch, hidden_dim)
    assert jnp.allclose(out32, ref32, atol=1e-4, rtol=1e-4), "f32 mismatch vs reference"

    # --- bf16 activations/weights path (halves HBM traffic; MXU-native). ---
    feat_bf = feat32.astype(jnp.bfloat16)
    mask_bf = mask32.astype(jnp.bfloat16)
    params_bf = init_params(k_par, input_dim, mask_input_dim, hidden_dim,
                            reduction_ratio=1.0, dtype=jnp.bfloat16)
    out_bf = jax.block_until_ready(
        mask_block(feat_bf, mask_bf, params_bf, batch_tile=128))
    ref_bf = mask_block_ref(feat_bf, mask_bf, params_bf)
    assert out_bf.shape == (batch, hidden_dim)
    assert jnp.allclose(out_bf.astype(jnp.float32), ref_bf, atol=5e-2, rtol=5e-2), \
        "bf16 mismatch vs reference"

    print("KERNEL_OK")
</pallas_src>

<mosaic_0001>
module attributes {stable_mosaic.version = 11 : i64} {
  func.func @maskblock_kernel(%arg0: i32, %arg1: memref<128x32xf32, #tpu.memory_space<vmem>>, %arg2: memref<128x16xf32, #tpu.memory_space<vmem>>, %arg3: memref<16x32xf32, #tpu.memory_space<vmem>>, %arg4: memref<32x32xf32, #tpu.memory_space<vmem>>, %arg5: memref<32x32xf32, #tpu.memory_space<vmem>>, %arg6: memref<5x32xf32, #tpu.memory_space<vmem>>, %arg7: memref<128x32xf32, #tpu.memory_space<vmem>>) attributes {dimension_semantics = [#tpu.dimension_semantics<parallel>], iteration_bounds = array<i64: 8>, scalar_prefetch = 0 : i64, scratch_operands = 0 : i64, tpu.core_type = #tpu.core_type<tc>, window_params = [{transform_indices = @transform_0, window_bounds = array<i64: 128, 32>}, {transform_indices = @transform_1, window_bounds = array<i64: 128, 16>}, {pipeline_mode = #tpu.pipeline_mode<synchronous>, transform_indices = @transform_2, window_bounds = array<i64: 16, 32>}, {pipeline_mode = #tpu.pipeline_mode<synchronous>, transform_indices = @transform_3, window_bounds = array<i64: 32, 32>}, {pipeline_mode = #tpu.pipeline_mode<synchronous>, transform_indices = @transform_4, window_bounds = array<i64: 32, 32>}, {pipeline_mode = #tpu.pipeline_mode<synchronous>, transform_indices = @transform_5, window_bounds = array<i64: 5, 32>}, {transform_indices = @transform_6, window_bounds = array<i64: 128, 32>}]} {
    %c0 = arith.constant 0 : index
    %c0_0 = arith.constant 0 : index
    %0 = vector.load %arg6[%c0, %c0_0] : memref<5x32xf32, #tpu.memory_space<vmem>>, vector<1x32xf32>
    %c1 = arith.constant 1 : index
    %c0_1 = arith.constant 0 : index
    %1 = vector.load %arg6[%c1, %c0_1] : memref<5x32xf32, #tpu.memory_space<vmem>>, vector<1x32xf32>
    %c2 = arith.constant 2 : index
    %c0_2 = arith.constant 0 : index
    %2 = vector.load %arg6[%c2, %c0_2] : memref<5x32xf32, #tpu.memory_space<vmem>>, vector<1x32xf32>
    %c3 = arith.constant 3 : index
    %c0_3 = arith.constant 0 : index
    %3 = vector.load %arg6[%c3, %c0_3] : memref<5x32xf32, #tpu.memory_space<vmem>>, vector<1x32xf32>
    %c4 = arith.constant 4 : index
    %c0_4 = arith.constant 0 : index
    %4 = vector.load %arg6[%c4, %c0_4] : memref<5x32xf32, #tpu.memory_space<vmem>>, vector<1x32xf32>
    %c0_5 = arith.constant 0 : index
    %c0_6 = arith.constant 0 : index
    %5 = vector.load %arg2[%c0_5, %c0_6] : memref<128x16xf32, #tpu.memory_space<vmem>>, vector<128x16xf32>
    %c0_7 = arith.constant 0 : index
    %c0_8 = arith.constant 0 : index
    %6 = vector.load %arg3[%c0_7, %c0_8] : memref<16x32xf32, #tpu.memory_space<vmem>>, vector<16x32xf32>
    %cst = arith.constant dense<0.000000e+00> : vector<128x32xf32>
    %7 = tpu.matmul %5, %6, %cst {dimension_numbers = #tpu.dot_dimension_numbers<[1], [0], [0], [1], [0, 0, 1, 1], [], []>} : vector<128x16xf32>, vector<16x32xf32>, vector<128x32xf32> -> vector<128x32xf32>
    %8 = vector.broadcast %0 : vector<1x32xf32> to vector<128x32xf32>
    %9 = arith.addf %7, %8 : vector<128x32xf32>
    %cst_9 = arith.constant 0.000000e+00 : f32
    %10 = vector.broadcast %cst_9 : f32 to vector<128x32xf32>
    %11 = arith.maximumf %9, %10 : vector<128x32xf32>
    %c0_10 = arith.constant 0 : index
    %c0_11 = arith.constant 0 : index
    %12 = vector.load %arg4[%c0_10, %c0_11] : memref<32x32xf32, #tpu.memory_space<vmem>>, vector<32x32xf32>
    %cst_12 = arith.constant dense<0.000000e+00> : vector<128x32xf32>
    %13 = tpu.matmul %11, %12, %cst_12 {dimension_numbers = #tpu.dot_dimension_numbers<[1], [0], [0], [1], [0, 0, 1, 1], [], []>} : vector<128x32xf32>, vector<32x32xf32>, vector<128x32xf32> -> vector<128x32xf32>
    %14 = vector.broadcast %1 : vector<1x32xf32> to vector<128x32xf32>
    %15 = arith.addf %13, %14 : vector<128x32xf32>
    %c0_13 = arith.constant 0 : index
    %c0_14 = arith.constant 0 : index
    %16 = vector.load %arg1[%c0_13, %c0_14] : memref<128x32xf32, #tpu.memory_space<vmem>>, vector<128x32xf32>
    %17 = arith.mulf %16, %15 : vector<128x32xf32>
    %c0_15 = arith.constant 0 : index
    %c0_16 = arith.constant 0 : index
    %18 = vector.load %arg5[%c0_15, %c0_16] : memref<32x32xf32, #tpu.memory_space<vmem>>, vector<32x32xf32>
    %cst_17 = arith.constant dense<0.000000e+00> : vector<128x32xf32>
    %19 = tpu.matmul %17, %18, %cst_17 {dimension_numbers = #tpu.dot_dimension_numbers<[1], [0], [0], [1], [0, 0, 1, 1], [], []>} : vector<128x32xf32>, vector<32x32xf32>, vector<128x32xf32> -> vector<128x32xf32>
    %20 = vector.broadcast %2 : vector<1x32xf32> to vector<128x32xf32>
    %21 = arith.addf %19, %20 : vector<128x32xf32>
    %cst_18 = arith.constant dense<0.000000e+00> : vector<128xf32>
    %22 = vector.multi_reduction <add>, %21, %cst_18 [1] : vector<128x32xf32> to vector<128xf32>
    %23 = vector.shape_cast %22 : vector<128xf32> to vector<128x1xf32>
    %24 = arith.mulf %21, %21 : vector<128x32xf32>
    %cst_19 = arith.constant dense<0.000000e+00> : vector<128xf32>
    %25 = vector.multi_reduction <add>, %24, %cst_19 [1] : vector<128x32xf32> to vector<128xf32>
    %26 = vector.shape_cast %25 : vector<128xf32> to vector<128x1xf32>
    %cst_20 = arith.constant 3.125000e-02 : f32
    %27 = vector.broadcast %cst_20 : f32 to vector<128x1xf32>
    %28 = arith.mulf %23, %27 : vector<128x1xf32>
    %cst_21 = arith.constant 3.125000e-02 : f32
    %29 = vector.broadcast %cst_21 : f32 to vector<128x1xf32>
    %30 = arith.mulf %26, %29 : vector<128x1xf32>
    %31 = arith.mulf %28, %28 : vector<128x1xf32>
    %32 = arith.subf %30, %31 : vector<128x1xf32>
    %33 = vector.broadcast %28 : vector<128x1xf32> to vector<128x32xf32>
    %34 = arith.subf %21, %33 : vector<128x32xf32>
    %cst_22 = arith.constant 9.99999974E-6 : f32
    %35 = vector.broadcast %cst_22 : f32 to vector<128x1xf32>
    %36 = arith.addf %32, %35 : vector<128x1xf32>
    %37 = math.rsqrt %36 : vector<128x1xf32>
    %38 = vector.broadcast %37 : vector<128x1xf32> to vector<128x32xf32>
    %39 = arith.mulf %34, %38 : vector<128x32xf32>
    %40 = vector.broadcast %3 : vector<1x32xf32> to vector<128x32xf32>
    %41 = arith.mulf %39, %40 : vector<128x32xf32>
    %42 = vector.broadcast %4 : vector<1x32xf32> to vector<128x32xf32>
    %43 = arith.addf %41, %42 : vector<128x32xf32>
    %cst_23 = arith.constant 0.000000e+00 : f32
    %44 = vector.broadcast %cst_23 : f32 to vector<128x32xf32>
    %45 = arith.maximumf %43, %44 : vector<128x32xf32>
    %c0_24 = arith.constant 0 : index
    %c0_25 = arith.constant 0 : index
    %46 = vector.load %arg7[%c0_24, %c0_25] : memref<128x32xf32, #tpu.memory_space<vmem>>, vector<128x32xf32>
    tpu.vector_store %arg7[%c0_24, %c0_25], %45 {strides = array<i32>} : memref<128x32xf32, #tpu.memory_space<vmem>>, vector<128x32xf32>,
    return
  }
  func.func @transform_0(%arg0: i32) -> (i32, i32) {
    %c0_i32 = arith.constant 0 : i32
    %c0_i32_0 = arith.constant 0 : i32
    return %arg0, %c0_i32 : i32, i32
  }
  func.func @transform_1(%arg0: i32) -> (i32, i32) {
    %c0_i32 = arith.constant 0 : i32
    %c0_i32_0 = arith.constant 0 : i32
    return %arg0, %c0_i32 : i32, i32
  }
  func.func @transform_2(%arg0: i32) -> (i32, i32) {
    %c0_i32 = arith.constant 0 : i32
    %c0_i32_0 = arith.constant 0 : i32
    %c0_i32_1 = arith.constant 0 : i32
    return %c0_i32, %c0_i32_0 : i32, i32
  }
  func.func @transform_3(%arg0: i32) -> (i32, i32) {
    %c0_i32 = arith.constant 0 : i32
    %c0_i32_0 = arith.constant 0 : i32
    %c0_i32_1 = arith.constant 0 : i32
    return %c0_i32, %c0_i32_0 : i32, i32
  }
  func.func @transform_4(%arg0: i32) -> (i32, i32) {
    %c0_i32 = arith.constant 0 : i32
    %c0_i32_0 = arith.constant 0 : i32
    %c0_i32_1 = arith.constant 0 : i32
    return %c0_i32, %c0_i32_0 : i32, i32
  }
  func.func @transform_5(%arg0: i32) -> (i32, i32) {
    %c0_i32 = arith.constant 0 : i32
    %c0_i32_0 = arith.constant 0 : i32
    %c0_i32_1 = arith.constant 0 : i32
    return %c0_i32, %c0_i32_0 : i32, i32
  }
  func.func @transform_6(%arg0: i32) -> (i32, i32) {
    %c0_i32 = arith.constant 0 : i32
    %c0_i32_0 = arith.constant 0 : i32
    return %arg0, %c0_i32 : i32, i32
  }
}

</mosaic_0001>

<bundles_post_ra>
// kernel: tpu_custom_call.1
= control target key start
LH: loop header
LB: loop body
LE: loop exit
PB: predicated region body
PF: predicated region fallthrough
CT: control target
= control target key end

     0   :  { %s1650_s21 = smov 0   ;;  %s2093_s0 = inlined_call_operand.vmem [shape: f32[1024,32], index: 0, kind: input, shape index: {}]   ;;  %s2094_s1 = inlined_call_operand.vmem [shape: f32[1024,16], index: 1, kind: input, shape index: {}]   ;;  %s2095_s2 = inlined_call_operand.vmem [shape: f32[16,32], index: 2, kind: input, shape index: {}]   ;;  %s2096_s3 = inlined_call_operand.vmem [shape: f32[32,32], index: 3, kind: input, shape index: {}]   ;;  %s2097_s4 = inlined_call_operand.vmem [shape: f32[32,32], index: 4, kind: input, shape index: {}]   ;;  %s2098_s5 = inlined_call_operand.vmem [shape: f32[5,32], index: 5, kind: input, shape index: {}]   ;;  %s2099_s6 = inlined_call_operand.vmem [shape: f32[1024,32], index: 6, kind: output, shape index: {}]  }
   0x1 LB: > { %s1329_s22 = sadd.s32 4294967295, %s1613_s21   ;;  %p1333_p0 = scmp.ge.s32.totalorder %s1613_s21, 1  ;;  %s1613_s21 = sphi %s1650_s21, %s16_s21  }
   0x2   : > { %p224_p1 = scmp.lt.s32.totalorder %s1613_s21, 9 }
   0x4   : > { %p225_p2 = pnand %p1333_p0, %p224_p1 }
   0x5   : > { %v298_v0 = vld [vmem:[%s2095_s2] sm:$0xff] (!%p225_p2)  ;;  %v299_v1 = vld [vmem:[%s2095_s2 + $0x8] sm:$0xff] (!%p225_p2)  ;;  %s1334_s27 = sshll.u32 (!%p225_p2), %s1329_s22, 4  ;;  %vm304_vm0 = vcmask (!%p225_p2), 130048   ;;  %v516_v6 = vld [vmem:[%s2096_s3 + $0x10] sm:$0xff] (!%p225_p2)  ;;  %vm522_vm1 = vcmask (!%p225_p2), 261120  }
   0x6   : > { %228 = sbr.rel (%p225_p2) target bundleno = 899 (0x383), region = 44  ;;  %v514_v2 = vld [vmem:[%s2096_s3] sm:$0xff] (!%p225_p2)  ;;  %v1545_v3 = vpack.c.bf16 (!%p225_p2), %v299_v1, %v298_v0  ;;  %p260_p3 = scmp.lt.s32.totalorder (!%p225_p2), %s1334_s27, 127  ;;  %v515_v4 = vld [vmem:[%s2096_s3 + $0x8] sm:$0xff] (!%p225_p2)  ;;  %v517_v7 = vld [vmem:[%s2096_s3 + $0x18] sm:$0xff] (!%p225_p2) }
   0x7   : > { %v1549_v5 = vpack.c.bf16 (!%p225_p2), %v515_v4, %v514_v2  ;;  %v1553_v12 = vpack.c.bf16 (!%p225_p2), %v517_v7, %v516_v6  ;;  %v748_v25 = vld [vmem:[%s2097_s4] sm:$0xff] (!%p225_p2)  ;;  %v749_v26 = vld [vmem:[%s2097_s4 + $0x8] sm:$0xff] (!%p225_p2)  ;;  %v750_v27 = vld [vmem:[%s2097_s4 + $0x10] sm:$0xff] (!%p225_p2) }
   0x8   : > { %1546 = vmatprep.subr.bf16.mxu0 (!%p225_p2), %v1545_v3  ;;  %1565 = vmatprep.subr.bf16.mxu1 (!%p225_p2), %v1545_v3  ;;  %v1557_v28 = vpack.c.bf16 (!%p225_p2), %v749_v26, %v748_v25  ;;  %v751_v29 = vld [vmem:[%s2097_s4 + $0x18] sm:$0xff] (!%p225_p2)  ;;  %v1340_v31 = vld [vmem:[%s2098_s5] ss:$0 sm:$0xff] (!%p225_p2) }
   0x9   : > { %1548 = vmatpush3.bf16.msra.mxu0 (!%p225_p2), %v1545_v3  ;;  %1566 = vmatpush3.bf16.msra.mxu1 (!%p225_p2), %v1545_v3  ;;  %v1561_v30 = vpack.c.bf16 (!%p225_p2), %v751_v29, %v750_v27 }
   0xa   : > { %1550 = vmatprep.subr.bf16.mxu1 (!%p225_p2), %v1549_v5  ;;  %1558 = vmatprep.subr.bf16.mxu0 (!%p225_p2), %v1557_v28 }
   0xd   : > { %s2101_s27 = smov (!%p260_p3, %s1334_s27), 127 }
   0xe   : > { %s1670_s8 = sshll.u32 %s2101_s27, 3 }
   0xf   : > { %s1676_s11 = scalar_lea.vmem %s2094_s1, %s1670_s8  ;;  %s1751_s29 = scalar_lea.vmem %s2093_s0, %s1670_s8 }
  0x10   : > { %v282_v8 = vld [vmem:[%s1676_s11] sm:$0xff]  ;;  %v283_v9 = vld [vmem:[%s1676_s11 + $0x8] sm:$0xff]  ;;  %v284_v10 = vld [vmem:[%s1676_s11 + $0x10] sm:$0xff]  ;;  %s1969_s17 = scalar_lea.vmem %s2099_s6, %s1670_s8 }
  0x11   : > { %1457 = vmatprep.mubr.msk.f32.mxu0 %vm304_vm0, %v282_v8  ;;  %v290_v11 = vld [vmem:[%s1676_s11 + $0x40] sm:$0xff]  ;;  %v285_v13 = vld [vmem:[%s1676_s11 + $0x18] sm:$0xff]  ;;  %v291_v14 = vld [vmem:[%s1676_s11 + $0x48] sm:$0xff] }
  0x12   : > { %1458 = vmatmul.mubr.msk.f32.vlgmr.msra.gmra.mrb[0].mxu0 %vm304_vm0, %v283_v9  ;;  %1469 = vmatprep.mubr.msk.f32.mxu1 %vm304_vm0, %v290_v11  ;;  %v292_v15 = vld [vmem:[%s1676_s11 + $0x50] sm:$0xff]  ;;  %v286_v16 = vld [vmem:[%s1676_s11 + $0x20] sm:$0xff]  ;;  %v293_v17 = vld [vmem:[%s1676_s11 + $0x58] sm:$0xff] }
  0x13   : > { %1460 = vmatprep.mubr.msk.f32.mxu0 %vm304_vm0, %v284_v10  ;;  %1470 = vmatmul.mubr.msk.f32.vlgmr.msra.gmra.mrb[0].mxu1 %vm304_vm0, %v291_v14  ;;  %v294_v18 = vld [vmem:[%s1676_s11 + $0x60] sm:$0xff]  ;;  %v287_v19 = vld [vmem:[%s1676_s11 + $0x28] sm:$0xff]  ;;  %v288_v20 = vld [vmem:[%s1676_s11 + $0x30] sm:$0xff] }
  0x14   : > { %1472 = vmatprep.mubr.msk.f32.mxu1 %vm304_vm0, %v292_v15  ;;  %1552 = vmatpush3.bf16.msra.mxu1 %v1549_v5  ;;  %v295_v21 = vld [vmem:[%s1676_s11 + $0x68] sm:$0xff]  ;;  %v296_v22 = vld [vmem:[%s1676_s11 + $0x70] sm:$0xff]  ;;  %v289_v23 = vld [vmem:[%s1676_s11 + $0x38] sm:$0xff] }
  0x15   : > { %1554 = vmatprep.subr.bf16.mxu1 %v1553_v12  ;;  %v297_v24 = vld [vmem:[%s1676_s11 + $0x78] sm:$0xff]  ;;  %1560 = vmatpush3.bf16.msra.mxu0 %v1557_v28  ;;  %v718_v28 = vld [vmem:[%s1751_s29 + $0x10] sm:$0xff] }
  0x16   : > { %1461 = vmatmul.mubr.msk.f32.gmra.mrb[2].mxu0 %vm304_vm0, %v285_v13  ;;  %1562 = vmatprep.subr.bf16.mxu0 %v1561_v30  ;;  %v719_v29 = vld [vmem:[%s1751_s29 + $0x18] sm:$0xff] }
  0x17   : > { %1463 = vmatprep.mubr.msk.f32.mxu0 %vm304_vm0, %v286_v16  ;;  %1473 = vmatmul.mubr.msk.f32.gmra.mrb[2].mxu1 %vm304_vm0, %v293_v17  ;;  %v1756_v16 = vld [vmem:[%s2098_s5 + $0x1] ss:$0 sm:$0xff] }
  0x18   : > { %1475 = vmatprep.mubr.msk.f32.mxu1 %vm304_vm0, %v294_v18  ;;  %1556 = vmatpush3.bf16.msra.mxu1 %v1553_v12 }
  0x19   : > { %1564 = vmatpush3.bf16.msra.mxu0 %v1561_v30 }
  0x1a   : > { %1464 = vmatmul.mubr.msk.f32.gmra.mrb[4].mxu0 %vm304_vm0, %v287_v19 }
  0x1b   : > { %1466 = vmatprep.mubr.msk.f32.mxu0 %vm304_vm0, %v288_v20  ;;  %1476 = vmatmul.mubr.msk.f32.gmra.mrb[4].mxu1 %vm304_vm0, %v295_v21  ;;  %v716_v20 = vld [vmem:[%s1751_s29] sm:$0xff]  ;;  %v717_v21 = vld [vmem:[%s1751_s29 + $0x8] sm:$0xff] }
  0x1c   : > { %1478 = vmatprep.mubr.msk.f32.mxu1 %vm304_vm0, %v296_v22 }
  0x1e   : > { %1467 = vmatmul.mubr.msk.f32.gmra.mrb[6].mxu0 %vm304_vm0, %v289_v23 }
  0x1f   : > { %1479 = vmatmul.mubr.msk.f32.gmra.mrb[6].mxu1 %vm304_vm0, %v297_v24 }
  0xe5   : > { %v1459_v32 = vpop.f32.mrb[0].mxu0 }
  0xe6   : > { %v425_v33 = vadd.f32 %v1459_v32, %v1340_v31  ;;  %v419_v34 = vpop.f32.mrb[1].mxu0  ;;  %v1471_v36 = vpop.f32.mrb[0].mxu1 }
  0xe7   : > { %v420_v35 = vadd.f32 %v1340_v31, %v419_v34  ;;  %v459_v37 = vpop.f32.mrb[1].mxu1  ;;  %v465_v63 = vadd.f32 %v1471_v36, %v1340_v31 }
  0xe8   : > { %v499_v40 = vmax.f32 %v425_v33, 0.0  ;;  %v460_v57 = vadd.f32 %v1340_v31, %v459_v37  ;;  %v721_v33 = vld [vmem:[%s1751_s29 + $0x28] sm:$0xff]  ;;  %v720_v37 = vld [vmem:[%s1751_s29 + $0x20] sm:$0xff] }
  0xe9   : > { %v498_v38 = vmax.f32 %v420_v35, 0.0  ;;  %v1462_v39 = vpop.f32.mrb[2].mxu0  ;;  %v507_v4 = vmax.f32 %v465_v63, 0.0 }
  0xea   : > { %v435_v41 = vadd.f32 %v1462_v39, %v1340_v31  ;;  %v429_v42 = vpop.f32.mrb[3].mxu0  ;;  %v1474_v44 = vpop.f32.mrb[2].mxu1  ;;  %v506_v2 = vmax.f32 %v460_v57, 0.0 }
  0xeb   : > { %v430_v43 = vadd.f32 %v1340_v31, %v429_v42  ;;  %1489 = vmatprep.mubr.msk.f32.mxu1 %vm522_vm1, %v498_v38  ;;  %v469_v46 = vpop.f32.mrb[3].mxu1  ;;  %v475_v5 = vadd.f32 %v1474_v44, %v1340_v31  ;;  %v723_v42 = vld [vmem:[%s1751_s29 + $0x38] sm:$0xff] }
  0xec   : > { %v501_v45 = vmax.f32 %v435_v41, 0.0  ;;  %1490 = vmatmul.mubr.msk.f32.vlgmr.msra.gmra.mrb[8].mxu1 %vm522_vm1, %v499_v40  ;;  %v470_v3 = vadd.f32 %v1340_v31, %v469_v46 }
  0xed   : > { %v500_v47 = vmax.f32 %v430_v43, 0.0  ;;  %v1465_v48 = vpop.f32.mrb[4].mxu0  ;;  %v509_v8 = vmax.f32 %v475_v5, 0.0  ;;  %v728_v5 = vld [vmem:[%s1751_s29 + $0x60] sm:$0xff] }
  0xee   : > { %v445_v49 = vadd.f32 %v1465_v48, %v1340_v31  ;;  %v439_v50 = vpop.f32.mrb[5].mxu0  ;;  %v1477_v52 = vpop.f32.mrb[4].mxu1  ;;  %v508_v6 = vmax.f32 %v470_v3, 0.0 }
  0xef   : > { %1492 = vmatprep.mubr.msk.f32.mxu1 %vm522_vm1, %v500_v47  ;;  %v440_v51 = vadd.f32 %v1340_v31, %v439_v50  ;;  %v479_v54 = vpop.f32.mrb[5].mxu1  ;;  %v485_v9 = vadd.f32 %v1477_v52, %v1340_v31  ;;  %v725_v50 = vld [vmem:[%s1751_s29 + $0x48] sm:$0xff] }
  0xf0   : > { %1493 = vmatmul.mubr.msk.f32.gmra.mrb[10].mxu1 %vm522_vm1, %v501_v45  ;;  %v503_v53 = vmax.f32 %v445_v49, 0.0  ;;  %v480_v7 = vadd.f32 %v1340_v31, %v479_v54  ;;  %v722_v45 = vld [vmem:[%s1751_s29 + $0x30] sm:$0xff] }
  0xf1   : > { %v502_v55 = vmax.f32 %v440_v51, 0.0  ;;  %v1468_v56 = vpop.f32.mrb[6].mxu0  ;;  %v511_v12 = vmax.f32 %v485_v9, 0.0 }
  0xf2   : > { %v455_v58 = vadd.f32 %v1468_v56, %v1340_v31  ;;  %v449_v59 = vpop.f32.mrb[7].mxu0  ;;  %v1480_v61 = vpop.f32.mrb[6].mxu1  ;;  %v510_v10 = vmax.f32 %v480_v7, 0.0 }
  0xf3   : > { %1495 = vmatprep.mubr.msk.f32.mxu1 %vm522_vm1, %v502_v55  ;;  %v450_v60 = vadd.f32 %v1340_v31, %v449_v59  ;;  %v489_v0 = vpop.f32.mrb[7].mxu1  ;;  %v495_v13 = vadd.f32 %v1480_v61, %v1340_v31  ;;  %v726_v61 = vld [vmem:[%s1751_s29 + $0x50] sm:$0xff] }
  0xf4   : > { %1496 = vmatmul.mubr.msk.f32.gmra.mrb[12].mxu1 %vm522_vm1, %v503_v53  ;;  %v505_v62 = vmax.f32 %v455_v58, 0.0  ;;  %v490_v11 = vadd.f32 %v1340_v31, %v489_v0  ;;  %v724_v53 = vld [vmem:[%s1751_s29 + $0x40] sm:$0xff]  ;;  %v727_v58 = vld [vmem:[%s1751_s29 + $0x58] sm:$0xff] }
  0xf5   : > { %v504_v1 = vmax.f32 %v450_v60, 0.0  ;;  %v513_v15 = vmax.f32 %v495_v13, 0.0  ;;  %v730_v13 = vld [vmem:[%s1751_s29 + $0x70] sm:$0xff] }
  0xf6   : > { %v512_v14 = vmax.f32 %v490_v11, 0.0 }
  0xf7   : > { %1498 = vmatprep.mubr.msk.f32.mxu1 %vm522_vm1, %v504_v1 }
  0xf8   : > { %1499 = vmatmul.mubr.msk.f32.gmra.mrb[14].mxu1 %vm522_vm1, %v505_v62 }
  0xf9   : > { %1501 = vmatprep.mubr.msk.f32.mxu1 %vm522_vm1, %v506_v2  ;;  %v729_v2 = vld [vmem:[%s1751_s29 + $0x68] sm:$0xff] }
  0xfc   : > { %1502 = vmatmul.mubr.msk.f32.gmra.mrb[16].mxu1 %vm522_vm1, %v507_v4 }
  0xfd   : > { %1504 = vmatprep.mubr.msk.f32.mxu1 %vm522_vm1, %v508_v6 }
 0x100   : > { %1505 = vmatmul.mubr.msk.f32.gmra.mrb[18].mxu1 %vm522_vm1, %v509_v8 }
 0x101   : > { %1507 = vmatprep.mubr.msk.f32.mxu1 %vm522_vm1, %v510_v10  ;;  %v731_v10 = vld [vmem:[%s1751_s29 + $0x78] sm:$0xff] }
 0x104   : > { %1508 = vmatmul.mubr.msk.f32.gmra.mrb[20].mxu1 %vm522_vm1, %v511_v12 }
 0x105   : > { %1510 = vmatprep.mubr.msk.f32.mxu1 %vm522_vm1, %v512_v14 }
 0x108   : > { %1511 = vmatmul.mubr.msk.f32.gmra.mrb[22].mxu1 %vm522_vm1, %v513_v15 }
 0x1bf   : > { %v1491_v17 = vpop.f32.mrb[8].mxu1 }
 0x1c0   : > { %v643_v18 = vadd.f32 %v1491_v17, %v1756_v16  ;;  %v637_v19 = vpop.f32.mrb[9].mxu1 }
 0x1c1   : > { %v638_v22 = vadd.f32 %v1756_v16, %v637_v19 }
 0x1c2   : > { %v733_v25 = vmul.f32 %v717_v21, %v643_v18  ;;  %v1809_v18 = vld [vmem:[%s2098_s5 + $0x2] ss:$0 sm:$0xff] }
 0x1c3   : > { %v732_v23 = vmul.f32 %v716_v20, %v638_v22  ;;  %v1494_v24 = vpop.f32.mrb[10].mxu1 }
 0x1c4   : > { %v653_v26 = vadd.f32 %v1494_v24, %v1756_v16  ;;  %v647_v27 = vpop.f32.mrb[11].mxu1 }
 0x1c5   : > { %v648_v30 = vadd.f32 %v1756_v16, %v647_v27  ;;  %1521 = vmatprep.mubr.msk.f32.mxu0 %vm522_vm1, %v732_v23 }
 0x1c6   : > { %1522 = vmatmul.mubr.msk.f32.vlgmr.msra.gmra.mrb[8].mxu0 %vm522_vm1, %v733_v25  ;;  %v735_v34 = vmul.f32 %v719_v29, %v653_v26 }
 0x1c7   : > { %v734_v31 = vmul.f32 %v718_v28, %v648_v30  ;;  %v1497_v32 = vpop.f32.mrb[12].mxu1 }
 0x1c8   : > { %v663_v35 = vadd.f32 %v1497_v32, %v1756_v16  ;;  %v657_v36 = vpop.f32.mrb[13].mxu1 }
 0x1c9   : > { %1524 = vmatprep.mubr.msk.f32.mxu0 %vm522_vm1, %v734_v31  ;;  %v658_v38 = vadd.f32 %v1756_v16, %v657_v36 }
 0x1ca   : > { %1525 = vmatmul.mubr.msk.f32.gmra.mrb[10].mxu0 %vm522_vm1, %v735_v34  ;;  %v737_v39 = vmul.f32 %v721_v33, %v663_v35 }
 0x1cb   : > { %v736_v40 = vmul.f32 %v720_v37, %v658_v38  ;;  %v1500_v41 = vpop.f32.mrb[14].mxu1 }
 0x1cc   : > { %v673_v43 = vadd.f32 %v1500_v41, %v1756_v16  ;;  %v667_v44 = vpop.f32.mrb[15].mxu1 }
 0x1cd   : > { %1527 = vmatprep.mubr.msk.f32.mxu0 %vm522_vm1, %v736_v40  ;;  %v668_v46 = vadd.f32 %v1756_v16, %v667_v44 }
 0x1ce   : > { %1528 = vmatmul.mubr.msk.f32.gmra.mrb[12].mxu0 %vm522_vm1, %v737_v39  ;;  %v739_v47 = vmul.f32 %v723_v42, %v673_v43 }
 0x1cf   : > { %v738_v48 = vmul.f32 %v722_v45, %v668_v46  ;;  %v1503_v49 = vpop.f32.mrb[16].mxu1 }
 0x1d0   : > { %v683_v51 = vadd.f32 %v1503_v49, %v1756_v16  ;;  %v677_v52 = vpop.f32.mrb[17].mxu1 }
 0x1d1   : > { %1530 = vmatprep.mubr.msk.f32.mxu0 %vm522_vm1, %v738_v48  ;;  %v678_v54 = vadd.f32 %v1756_v16, %v677_v52 }
 0x1d2   : > { %1531 = vmatmul.mubr.msk.f32.gmra.mrb[14].mxu0 %vm522_vm1, %v739_v47  ;;  %v741_v55 = vmul.f32 %v725_v50, %v683_v51 }
 0x1d3   : > { %v740_v56 = vmul.f32 %v724_v53, %v678_v54  ;;  %v1506_v57 = vpop.f32.mrb[18].mxu1 }
 0x1d4   : > { %v693_v59 = vadd.f32 %v1506_v57, %v1756_v16  ;;  %v687_v60 = vpop.f32.mrb[19].mxu1 }
 0x1d5   : > { %1533 = vmatprep.mubr.msk.f32.mxu0 %vm522_vm1, %v740_v56  ;;  %v688_v62 = vadd.f32 %v1756_v16, %v687_v60 }
 0x1d6   : > { %1534 = vmatmul.mubr.msk.f32.gmra.mrb[16].mxu0 %vm522_vm1, %v741_v55  ;;  %v743_v63 = vmul.f32 %v727_v58, %v693_v59 }
 0x1d7   : > { %v742_v0 = vmul.f32 %v726_v61, %v688_v62  ;;  %v1509_v1 = vpop.f32.mrb[20].mxu1 }
 0x1d8   : > { %v703_v3 = vadd.f32 %v1509_v1, %v1756_v16  ;;  %v697_v4 = vpop.f32.mrb[21].mxu1 }
 0x1d9   : > { %1536 = vmatprep.mubr.msk.f32.mxu0 %vm522_vm1, %v742_v0  ;;  %v698_v6 = vadd.f32 %v1756_v16, %v697_v4 }
 0x1da   : > { %1537 = vmatmul.mubr.msk.f32.gmra.mrb[18].mxu0 %vm522_vm1, %v743_v63  ;;  %v745_v7 = vmul.f32 %v729_v2, %v703_v3 }
 0x1db   : > { %v744_v8 = vmul.f32 %v728_v5, %v698_v6  ;;  %v1512_v9 = vpop.f32.mrb[22].mxu1 }
 0x1dc   : > { %v713_v11 = vadd.f32 %v1512_v9, %v1756_v16  ;;  %v707_v12 = vpop.f32.mrb[23].mxu1 }
 0x1dd   : > { %1539 = vmatprep.mubr.msk.f32.mxu0 %vm522_vm1, %v744_v8  ;;  %v708_v14 = vadd.f32 %v1756_v16, %v707_v12 }
 0x1de   : > { %1540 = vmatmul.mubr.msk.f32.gmra.mrb[20].mxu0 %vm522_vm1, %v745_v7  ;;  %v747_v15 = vmul.f32 %v731_v10, %v713_v11 }
 0x1df   : > { %v746_v17 = vmul.f32 %v730_v13, %v708_v14 }
 0x1e1   : > { %1542 = vmatprep.mubr.msk.f32.mxu0 %vm522_vm1, %v746_v17 }
 0x1e2   : > { %1543 = vmatmul.mubr.msk.f32.gmra.mrb[22].mxu0 %vm522_vm1, %v747_v15 }
 0x299   : > { %v1523_v19 = vpop.f32.mrb[8].mxu0 }
 0x29a   : > { %v1812_v20 = vadd.f32 %v1523_v19, %v1809_v18  ;;  %v870_v21 = vpop.f32.mrb[9].mxu0 }
 0x29b   : > { %v1815_v16 = vadd.f32 %v1809_v18, %v870_v21 }
 0x29c   : > { %v952_v22 = vsel %vm522_vm1, %v1812_v20, 0.0  ;;  %v998_v23 = vmul.f32 %v1812_v20, %v1812_v20 }
 0x29d   : > { %953 = vadd.xlane.f32.xlu0 %v952_v22  ;;  %v1526_v24 = vpop.f32.mrb[10].mxu0  ;;  %v949_v29 = vsel %vm522_vm1, %v1815_v16, 0.0  ;;  %v997_v30 = vmul.f32 %v1815_v16, %v1815_v16 }
 0x29e   : > { %v1822_v25 = vadd.f32 %v1526_v24, %v1809_v18  ;;  %v880_v26 = vpop.f32.mrb[11].mxu0  ;;  %v1016_v27 = vsel %vm522_vm1, %v998_v23, 0.0 }
 0x29f   : > { %1017 = vadd.xlane.f32.xlu1 %v1016_v27  ;;  %v1826_v28 = vadd.f32 %v1809_v18, %v880_v26  ;;  %v1013_v34 = vsel %vm522_vm1, %v997_v30, 0.0 }
 0x2a0   : > { %v958_v32 = vsel %vm522_vm1, %v1822_v25, 0.0  ;;  %v1000_v38 = vmul.f32 %v1822_v25, %v1822_v25 }
 0x2a1   : > { %950 = vadd.xlane.f32.xlu0 %v949_v29  ;;  %v1529_v31 = vpop.f32.mrb[12].mxu0  ;;  %v999_v35 = vmul.f32 %v1826_v28, %v1826_v28  ;;  %v955_v37 = vsel %vm522_vm1, %v1826_v28, 0.0 }
 0x2a2   : > { %v890_v33 = vpop.f32.mrb[13].mxu0  ;;  %v1846_v43 = vadd.f32 %v1529_v31, %v1809_v18  ;;  %v1022_v44 = vsel %vm522_vm1, %v1000_v38, 0.0 }
 0x2a3   : > { %959 = vadd.xlane.f32.xlu1 %v958_v32  ;;  %v1842_v40 = vadd.f32 %v1809_v18, %v890_v33  ;;  %v1019_v41 = vsel %vm522_vm1, %v999_v35, 0.0 }
 0x2a4   : > { %v964_v49 = vsel %vm522_vm1, %v1846_v43, 0.0  ;;  %v1002_v50 = vmul.f32 %v1846_v43, %v1846_v43 }
 0x2a5   : > { %1014 = vadd.xlane.f32.xlu0 %v1013_v34  ;;  %v1532_v36 = vpop.f32.mrb[14].mxu0  ;;  %v961_v46 = vsel %vm522_vm1, %v1842_v40, 0.0  ;;  %v1001_v47 = vmul.f32 %v1842_v40, %v1842_v40 }
 0x2a6   : > { %v900_v39 = vpop.f32.mrb[15].mxu0  ;;  %v1862_v55 = vadd.f32 %v1532_v36, %v1809_v18  ;;  %v1028_v56 = vsel %vm522_vm1, %v1002_v50, 0.0 }
 0x2a7   : > { %956 = vadd.xlane.f32.xlu1 %v955_v37  ;;  %v1858_v52 = vadd.f32 %v1809_v18, %v900_v39  ;;  %v1025_v53 = vsel %vm522_vm1, %v1001_v47, 0.0 }
 0x2a8   : > { %v970_v61 = vsel %vm522_vm1, %v1862_v55, 0.0  ;;  %v1004_v62 = vmul.f32 %v1862_v55, %v1862_v55 }
 0x2a9   : > { %1020 = vadd.xlane.f32.xlu0 %v1019_v41  ;;  %v1535_v42 = vpop.f32.mrb[16].mxu0  ;;  %v967_v58 = vsel %vm522_vm1, %v1858_v52, 0.0  ;;  %v1003_v59 = vmul.f32 %v1858_v52, %v1858_v52 }
 0x2aa   : > { %v910_v45 = vpop.f32.mrb[17].mxu0  ;;  %v1878_v2 = vadd.f32 %v1535_v42, %v1809_v18  ;;  %v1034_v3 = vsel %vm522_vm1, %v1004_v62, 0.0 }
 0x2ab   : > { %1023 = vadd.xlane.f32.xlu1 %v1022_v44  ;;  %v1874_v0 = vadd.f32 %v1809_v18, %v910_v45  ;;  %v1031_v1 = vsel %vm522_vm1, %v1003_v59, 0.0 }
 0x2ac   : > { %v976_v6 = vsel %vm522_vm1, %v1878_v2, 0.0  ;;  %v1006_v7 = vmul.f32 %v1878_v2, %v1878_v2 }
 0x2ad   : > { %962 = vadd.xlane.f32.xlu0 %v961_v46  ;;  %v1538_v48 = vpop.f32.mrb[18].mxu0  ;;  %v973_v4 = vsel %vm522_vm1, %v1874_v0, 0.0  ;;  %v1005_v5 = vmul.f32 %v1874_v0, %v1874_v0 }
 0x2ae   : > { %v920_v51 = vpop.f32.mrb[19].mxu0  ;;  %v1894_v10 = vadd.f32 %v1538_v48, %v1809_v18  ;;  %v1040_v11 = vsel %vm522_vm1, %v1006_v7, 0.0 }
 0x2af   : > { %965 = vadd.xlane.f32.xlu1 %v964_v49  ;;  %v1890_v8 = vadd.f32 %v1809_v18, %v920_v51  ;;  %v1037_v9 = vsel %vm522_vm1, %v1005_v5, 0.0 }
 0x2b0   : > { %v982_v14 = vsel %vm522_vm1, %v1894_v10, 0.0  ;;  %v1008_v15 = vmul.f32 %v1894_v10, %v1894_v10 }
 0x2b1   : > { %1026 = vadd.xlane.f32.xlu0 %v1025_v53  ;;  %v1541_v54 = vpop.f32.mrb[20].mxu0  ;;  %v979_v12 = vsel %vm522_vm1, %v1890_v8, 0.0  ;;  %v1007_v13 = vmul.f32 %v1890_v8, %v1890_v8 }
 0x2b2   : > { %v930_v57 = vpop.f32.mrb[21].mxu0  ;;  %v1910_v21 = vadd.f32 %v1541_v54, %v1809_v18  ;;  %v1046_v22 = vsel %vm522_vm1, %v1008_v15, 0.0 }
 0x2b3   : > { %1029 = vadd.xlane.f32.xlu1 %v1028_v56  ;;  %v1906_v17 = vadd.f32 %v1809_v18, %v930_v57  ;;  %v1043_v19 = vsel %vm522_vm1, %v1007_v13, 0.0 }
 0x2b4   : > { %v988_v26 = vsel %vm522_vm1, %v1910_v21, 0.0  ;;  %v1010_v27 = vmul.f32 %v1910_v21, %v1910_v21 }
 0x2b5   : > { %968 = vadd.xlane.f32.xlu0 %v967_v58  ;;  %v1544_v60 = vpop.f32.mrb[22].mxu0  ;;  %v985_v23 = vsel %vm522_vm1, %v1906_v17, 0.0  ;;  %v1009_v24 = vmul.f32 %v1906_v17, %v1906_v17 }
 0x2b6   : > { %v940_v63 = vpop.f32.mrb[23].mxu0  ;;  %v1926_v31 = vadd.f32 %v1544_v60, %v1809_v18  ;;  %v1052_v32 = vsel %vm522_vm1, %v1010_v27, 0.0 }
 0x2b7   : > { %971 = vadd.xlane.f32.xlu1 %v970_v61  ;;  %v1922_v29 = vadd.f32 %v1809_v18, %v940_v63  ;;  %v1049_v30 = vsel %vm522_vm1, %v1009_v24, 0.0  ;;  %v1956_v24 = vld [vmem:[%s2098_s5 + $0x4] ss:$0 sm:$0xff] }
 0x2b8   : > { %v994_v35 = vsel %vm522_vm1, %v1926_v31, 0.0  ;;  %v1012_v36 = vmul.f32 %v1926_v31, %v1926_v31 }
 0x2b9   : > { %1032 = vadd.xlane.f32.xlu0 %v1031_v1  ;;  %v991_v33 = vsel %vm522_vm1, %v1922_v29, 0.0  ;;  %v1011_v34 = vmul.f32 %v1922_v29, %v1922_v29 }
 0x2ba   : > { %v1058_v37 = vsel %vm522_vm1, %v1012_v36, 0.0 }
 0x2bb   : > { %1035 = vadd.xlane.f32.xlu1 %v1034_v3  ;;  %v1055_v18 = vsel %vm522_vm1, %v1011_v34, 0.0 }
 0x2bd   : > { %974 = vadd.xlane.f32.xlu0 %v973_v4 }
 0x2bf   : > { %977 = vadd.xlane.f32.xlu1 %v976_v6 }
 0x2c1   : > { %1038 = vadd.xlane.f32.xlu0 %v1037_v9 }
 0x2c3   : > { %1041 = vadd.xlane.f32.xlu1 %v1040_v11 }
 0x2c5   : > { %980 = vadd.xlane.f32.xlu0 %v979_v12 }
 0x2c7   : > { %983 = vadd.xlane.f32.xlu1 %v982_v14  ;;  %v1949_v14 = vld [vmem:[%s2098_s5 + $0x3] ss:$0 sm:$0xff] }
 0x2c9   : > { %1044 = vadd.xlane.f32.xlu0 %v1043_v19 }
 0x2cb   : > { %1047 = vadd.xlane.f32.xlu1 %v1046_v22 }
 0x2cd   : > { %986 = vadd.xlane.f32.xlu0 %v985_v23 }
 0x2cf   : > { %989 = vadd.xlane.f32.xlu1 %v988_v26 }
 0x2d1   : > { %1050 = vadd.xlane.f32.xlu0 %v1049_v30 }
 0x2d3   : > { %1053 = vadd.xlane.f32.xlu1 %v1052_v32 }
 0x2d5   : > { %992 = vadd.xlane.f32.xlu0 %v991_v33 }
 0x2d7   : > { %995 = vadd.xlane.f32.xlu1 %v994_v35 }
 0x2d9   : > { %1056 = vadd.xlane.f32.xlu0 %v1055_v18 }
 0x2db   : > { %1059 = vadd.xlane.f32.xlu1 %v1058_v37 }
 0x32a   : > { %v954_v38 = vpop.xlane.xlu0 %953 }
 0x32b   : > { %v1062_v39 = vmul.f32 0.03125, %v954_v38 }
 0x32c   : > { %v1018_v41 = vpop.xlane.xlu1 %1017 }
 0x32d   : > { %v1094_v42 = vmul.f32 %v1062_v39, %v1062_v39  ;;  %v1078_v44 = vmul.f32 0.03125, %v1018_v41  ;;  %v1126_v11 = vsub.f32 %v1812_v20, %v1062_v39 }
 0x32e   : > { %v951_v45 = vpop.xlane.xlu0 %950 }
 0x32f   : > { %v1110_v46 = vsub.f32 %v1078_v44, %v1094_v42  ;;  %v1061_v47 = vmul.f32 0.03125, %v951_v45 }
 0x330   : > { %v960_v48 = vpop.xlane.xlu1 %959 }
 0x331   : > { %v1142_v49 = vadd.f32 1e-05, %v1110_v46  ;;  %v1093_v51 = vmul.f32 %v1061_v47, %v1061_v47  ;;  %v1939_v56 = vmul.f32 0.03125, %v960_v48  ;;  %v1125_v36 = vsub.f32 %v1815_v16, %v1061_v47 }
 0x332   : > { %v1015_v50 = vpop.xlane.xlu0 %1014 }
 0x333   : > { %1575 = vrsqrt.f32 %v1142_v49  ;;  %v1077_v53 = vmul.f32 0.03125, %v1015_v50  ;;  %v1096_v1 = vmul.f32 %v1939_v56, %v1939_v56 }
 0x334   : > { %v957_v54 = vpop.xlane.xlu1 %956 }
 0x335   : > { %v1109_v57 = vsub.f32 %v1077_v53, %v1093_v51  ;;  %v1063_v58 = vmul.f32 0.03125, %v957_v54  ;;  %v1128_v54 = vsub.f32 %v1822_v25, %v1939_v56 }
 0x336   : > { %v1021_v59 = vpop.xlane.xlu0 %1020 }
 0x337   : > { %v1141_v60 = vadd.f32 1e-05, %v1109_v57  ;;  %v1095_v61 = vmul.f32 %v1063_v58, %v1063_v58  ;;  %v1079_v62 = vmul.f32 0.03125, %v1021_v59  ;;  %v1127_v47 = vsub.f32 %v1826_v28, %v1063_v58 }
 0x338   : > { %v1024_v63 = vpop.xlane.xlu1 %1023 }
 0x339   : > { %1577 = vrsqrt.f32 %v1141_v60  ;;  %v1111_v3 = vsub.f32 %v1079_v62, %v1095_v61  ;;  %v1080_v4 = vmul.f32 0.03125, %v1024_v63 }
 0x33a   : > { %v963_v5 = vpop.xlane.xlu0 %962 }
 0x33b   : > { %v1143_v6 = vadd.f32 1e-05, %v1111_v3  ;;  %v1112_v7 = vsub.f32 %v1080_v4, %v1096_v1  ;;  %v1943_v9 = vmul.f32 0.03125, %v963_v5 }
 0x33c   : > { %v966_v12 = vpop.xlane.xlu1 %965 }
 0x33d   : > { %v1576_v13 = vpop.eup %1575  ;;  %1579 = vrsqrt.f32 %v1143_v6  ;;  %v1144_v15 = vadd.f32 1e-05, %v1112_v7  ;;  %v1951_v22 = vmul.f32 0.03125, %v966_v12  ;;  %v1097_v20 = vmul.f32 %v1943_v9, %v1943_v9 }
 0x33e   : > { %v1174_v19 = vmul.f32 %v1576_v13, %v1126_v11  ;;  %v1027_v23 = vpop.xlane.xlu0 %1026 }
 0x33f   : > { %1581 = vrsqrt.f32 %v1144_v15  ;;  %v1081_v26 = vmul.f32 0.03125, %v1027_v23  ;;  %v1098_v32 = vmul.f32 %v1951_v22, %v1951_v22 }
 0x340   : > { %v1194_v27 = vmul.f32 %v1949_v14, %v1174_v19  ;;  %v1030_v30 = vpop.xlane.xlu1 %1029  ;;  %v1129_v19 = vsub.f32 %v1842_v40, %v1943_v9 }
 0x341   : > { %v1113_v33 = vsub.f32 %v1081_v26, %v1097_v20  ;;  %v1082_v34 = vmul.f32 0.03125, %v1030_v30 }
 0x342   : > { %v1214_v35 = vadd.f32 %v1956_v24, %v1194_v27  ;;  %v969_v18 = vpop.xlane.xlu0 %968 }
 0x343   : > { %v1578_v37 = vpop.eup %1577  ;;  %v1145_v38 = vadd.f32 1e-05, %v1113_v33  ;;  %v1114_v39 = vsub.f32 %v1082_v34, %v1098_v32  ;;  %v1971_v41 = vmul.f32 0.03125, %v969_v18  ;;  %v1130_v33 = vsub.f32 %v1846_v43, %v1951_v22 }
 0x344   : > { %v1230_v42 = vmax.f32 %v1214_v35, 0.0  ;;  %v1173_v44 = vmul.f32 %v1578_v37, %v1125_v36  ;;  %v972_v45 = vpop.xlane.xlu1 %971 }
 0x345   : > { %1583 = vrsqrt.f32 %v1145_v38  ;;  %v1146_v46 = vadd.f32 1e-05, %v1114_v39  ;;  %v1977_v48 = vmul.f32 0.03125, %v972_v45  ;;  %v1099_v51 = vmul.f32 %v1971_v41, %v1971_v41 }
 0x346   : > { %1246 = vst.msk [vmem:[%s1969_s17 + $0x8] sm:$0xff] %vm522_vm1, %v1230_v42  ;;  %v1193_v16 = vmul.f32 %v1949_v14, %v1173_v44  ;;  %v1033_v49 = vpop.xlane.xlu0 %1032 }
 0x347   : > { %v1580_v50 = vpop.eup %1579  ;;  %1585 = vrsqrt.f32 %v1146_v46  ;;  %v1083_v53 = vmul.f32 0.03125, %v1033_v49  ;;  %v1100_v28 = vmul.f32 %v1977_v48, %v1977_v48 }
 0x348   : > { %v1213_v57 = vadd.f32 %v1956_v24, %v1193_v16  ;;  %v1175_v59 = vmul.f32 %v1580_v50, %v1127_v47  ;;  %v1036_v60 = vpop.xlane.xlu1 %1035  ;;  %v1131_v50 = vsub.f32 %v1858_v52, %v1971_v41 }
 0x349   : > { %v1582_v61 = vpop.eup %1581  ;;  %v1115_v58 = vsub.f32 %v1083_v53, %v1099_v51  ;;  %v1084_v62 = vmul.f32 0.03125, %v1036_v60 }
 0x34a   : > { %v1229_v63 = vmax.f32 %v1213_v57, 0.0  ;;  %v1195_v1 = vmul.f32 %v1949_v14, %v1175_v59  ;;  %v1176_v3 = vmul.f32 %v1582_v61, %v1128_v54  ;;  %v975_v4 = vpop.xlane.xlu0 %974  ;;  %v1132_v61 = vsub.f32 %v1862_v55, %v1977_v48 }
 0x34b   : > { %v1147_v5 = vadd.f32 1e-05, %v1115_v58  ;;  %v1116_v6 = vsub.f32 %v1084_v62, %v1100_v28  ;;  %v1987_v7 = vmul.f32 0.03125, %v975_v4 }
 0x34c   : > { %1245 = vst.msk [vmem:[%s1969_s17] sm:$0xff] %vm522_vm1, %v1229_v63  ;;  %v1215_v25 = vadd.f32 %v1956_v24, %v1195_v1  ;;  %v1196_v56 = vmul.f32 %v1949_v14, %v1176_v3  ;;  %v978_v11 = vpop.xlane.xlu1 %977 }
 0x34d   : > { %1587 = vrsqrt.f32 %v1147_v5  ;;  %v1148_v12 = vadd.f32 1e-05, %v1116_v6  ;;  %v1996_v23 = vmul.f32 0.03125, %v978_v11  ;;  %v1101_v27 = vmul.f32 %v1987_v7, %v1987_v7 }
 0x34e   : > { %v1231_v13 = vmax.f32 %v1215_v25, 0.0  ;;  %v1216_v15 = vadd.f32 %v1956_v24, %v1196_v56  ;;  %v1039_v20 = vpop.xlane.xlu0 %1038 }
 0x34f   : > { %v1584_v26 = vpop.eup %1583  ;;  %1589 = vrsqrt.f32 %v1148_v12  ;;  %v1085_v30 = vmul.f32 0.03125, %v1039_v20  ;;  %v1102_v40 = vmul.f32 %v1996_v23, %v1996_v23 }
 0x350   : > { %1247 = vst.msk [vmem:[%s1969_s17 + $0x10] sm:$0xff] %vm522_vm1, %v1231_v13  ;;  %v1232_v32 = vmax.f32 %v1216_v15, 0.0  ;;  %v1177_v34 = vmul.f32 %v1584_v26, %v1129_v19  ;;  %v1042_v35 = vpop.xlane.xlu1 %1041  ;;  %v1133_v15 = vsub.f32 %v1874_v0, %v1987_v7 }
 0x351   : > { %v1586_v36 = vpop.eup %1585  ;;  %v1117_v9 = vsub.f32 %v1085_v30, %v1101_v27  ;;  %v1086_v18 = vmul.f32 0.03125, %v1042_v35 }
 0x352   : > { %1248 = vst.msk [vmem:[%s1969_s17 + $0x18] sm:$0xff] %vm522_vm1, %v1232_v32  ;;  %v1197_v37 = vmul.f32 %v1949_v14, %v1177_v34  ;;  %v1178_v38 = vmul.f32 %v1586_v36, %v1130_v33  ;;  %v981_v39 = vpop.xlane.xlu0 %980  ;;  %v1134_v33 = vsub.f32 %v1878_v2, %v1996_v23 }
 0x353   : > { %v1149_v42 = vadd.f32 1e-05, %v1117_v9  ;;  %v1118_v44 = vsub.f32 %v1086_v18, %v1102_v40  ;;  %v2009_v45 = vmul.f32 0.03125, %v981_v39 }
 0x354   : > { %v1217_v43 = vadd.f32 %v1956_v24, %v1197_v37  ;;  %v1198_v22 = vmul.f32 %v1949_v14, %v1178_v38  ;;  %v984_v46 = vpop.xlane.xlu1 %983 }
 0x355   : > { %1591 = vrsqrt.f32 %v1149_v42  ;;  %v1150_v16 = vadd.f32 1e-05, %v1118_v44  ;;  %v2016_v51 = vmul.f32 0.03125, %v984_v46  ;;  %v1103_v57 = vmul.f32 %v2009_v45, %v2009_v45 }
 0x356   : > { %v1233_v47 = vmax.f32 %v1217_v43, 0.0  ;;  %v1218_v49 = vadd.f32 %v1956_v24, %v1198_v22  ;;  %v1045_v53 = vpop.xlane.xlu0 %1044 }
 0x357   : > { %v1588_v54 = vpop.eup %1587  ;;  %1593 = vrsqrt.f32 %v1150_v16  ;;  %v1087_v59 = vmul.f32 0.03125, %v1045_v53  ;;  %v1104_v52 = vmul.f32 %v2016_v51, %v2016_v51  ;;  %v1135_v16 = vsub.f32 %v1890_v8, %v2009_v45 }
 0x358   : > { %1249 = vst.msk [vmem:[%s1969_s17 + $0x20] sm:$0xff] %vm522_vm1, %v1233_v47  ;;  %v1234_v60 = vmax.f32 %v1218_v49, 0.0  ;;  %v1179_v28 = vmul.f32 %v1588_v54, %v1131_v50  ;;  %v1048_v58 = vpop.xlane.xlu1 %1047 }
 0x359   : > { %v1590_v62 = vpop.eup %1589  ;;  %v1119_v41 = vsub.f32 %v1087_v59, %v1103_v57  ;;  %v1088_v63 = vmul.f32 0.03125, %v1048_v58  ;;  %v1136_v59 = vsub.f32 %v1894_v10, %v2016_v51 }
 0x35a   : > { %1250 = vst.msk [vmem:[%s1969_s17 + $0x28] sm:$0xff] %vm522_vm1, %v1234_v60  ;;  %v1199_v1 = vmul.f32 %v1949_v14, %v1179_v28  ;;  %v1180_v3 = vmul.f32 %v1590_v62, %v1132_v61  ;;  %v987_v4 = vpop.xlane.xlu0 %986 }
 0x35b   : > { %v1151_v5 = vadd.f32 1e-05, %v1119_v41  ;;  %v1120_v6 = vsub.f32 %v1088_v63, %v1104_v52  ;;  %v2029_v25 = vmul.f32 0.03125, %v987_v4 }
 0x35c   : > { %v1219_v55 = vadd.f32 %v1956_v24, %v1199_v1  ;;  %v1200_v48 = vmul.f32 %v1949_v14, %v1180_v3  ;;  %v990_v56 = vpop.xlane.xlu1 %989 }
 0x35d   : > { %1595 = vrsqrt.f32 %v1151_v5  ;;  %v1152_v11 = vadd.f32 1e-05, %v1120_v6  ;;  %v2036_v19 = vmul.f32 0.03125, %v990_v56  ;;  %v1105_v27 = vmul.f32 %v2029_v25, %v2029_v25 }
 0x35e   : > { %v1235_v12 = vmax.f32 %v1219_v55, 0.0  ;;  %v1220_v13 = vadd.f32 %v1956_v24, %v1200_v48  ;;  %v1051_v20 = vpop.xlane.xlu0 %1050  ;;  %v1137_v5 = vsub.f32 %v1906_v17, %v2029_v25 }
 0x35f   : > { %v1592_v26 = vpop.eup %1591  ;;  %1597 = vrsqrt.f32 %v1152_v11  ;;  %v1089_v30 = vmul.f32 0.03125, %v1051_v20  ;;  %v1106_v0 = vmul.f32 %v2036_v19, %v2036_v19  ;;  %v1138_v48 = vsub.f32 %v1910_v21, %v2036_v19 }
 0x360   : > { %1251 = vst.msk [vmem:[%s1969_s17 + $0x30] sm:$0xff] %vm522_vm1, %v1235_v12  ;;  %v1236_v32 = vmax.f32 %v1220_v13, 0.0  ;;  %v1181_v34 = vmul.f32 %v1592_v26, %v1133_v15  ;;  %v1054_v35 = vpop.xlane.xlu1 %1053 }
 0x361   : > { %v1594_v36 = vpop.eup %1593  ;;  %v1121_v7 = vsub.f32 %v1089_v30, %v1105_v27  ;;  %v1090_v40 = vmul.f32 0.03125, %v1054_v35 }
 0x362   : > { %1252 = vst.msk [vmem:[%s1969_s17 + $0x38] sm:$0xff] %vm522_vm1, %v1236_v32  ;;  %v1201_v9 = vmul.f32 %v1949_v14, %v1181_v34  ;;  %v1182_v18 = vmul.f32 %v1594_v36, %v1134_v33  ;;  %v993_v37 = vpop.xlane.xlu0 %992 }
 0x363   : > { %v1153_v38 = vadd.f32 1e-05, %v1121_v7  ;;  %v1122_v39 = vsub.f32 %v1090_v40, %v1106_v0  ;;  %v1075_v42 = vmul.f32 0.03125, %v993_v37 }
 0x364   : > { %v1221_v2 = vadd.f32 %v1956_v24, %v1201_v9  ;;  %v1202_v23 = vmul.f32 %v1949_v14, %v1182_v18  ;;  %v996_v44 = vpop.xlane.xlu1 %995 }
 0x365   : > { %1599 = vrsqrt.f32 %v1153_v38  ;;  %v1154_v43 = vadd.f32 1e-05, %v1122_v39  ;;  %v1076_v47 = vmul.f32 0.03125, %v996_v44  ;;  %v1107_v53 = vmul.f32 %v1075_v42, %v1075_v42 }
 0x366   : > { %v1237_v22 = vmax.f32 %v1221_v2, 0.0  ;;  %v1222_v46 = vadd.f32 %v1956_v24, %v1202_v23  ;;  %v1057_v49 = vpop.xlane.xlu0 %1056  ;;  %v1139_v26 = vsub.f32 %v1922_v29, %v1075_v42 }
 0x367   : > { %v1596_v50 = vpop.eup %1595  ;;  %1601 = vrsqrt.f32 %v1154_v43  ;;  %v1091_v54 = vmul.f32 0.03125, %v1057_v49  ;;  %v1108_v58 = vmul.f32 %v1076_v47, %v1076_v47  ;;  %v1140_v27 = vsub.f32 %v1926_v31, %v1076_v47 }
 0x368   : > { %1253 = vst.msk [vmem:[%s1969_s17 + $0x40] sm:$0xff] %vm522_vm1, %v1237_v22  ;;  %v1238_v57 = vmax.f32 %v1222_v46, 0.0  ;;  %v1183_v60 = vmul.f32 %v1596_v50, %v1135_v16  ;;  %v1060_v61 = vpop.xlane.xlu1 %1059 }
 0x369   : > { %v1598_v28 = vpop.eup %1597  ;;  %v1123_v62 = vsub.f32 %v1091_v54, %v1107_v53  ;;  %v1092_v8 = vmul.f32 0.03125, %v1060_v61 }
 0x36a   : > { %1254 = vst.msk [vmem:[%s1969_s17 + $0x48] sm:$0xff] %vm522_vm1, %v1238_v57  ;;  %v1203_v45 = vmul.f32 %v1949_v14, %v1183_v60  ;;  %v1184_v52 = vmul.f32 %v1598_v28, %v1136_v59 }
 0x36b   : > { %v1155_v41 = vadd.f32 1e-05, %v1123_v62  ;;  %v1124_v63 = vsub.f32 %v1092_v8, %v1108_v58 }
 0x36c   : > { %v1223_v1 = vadd.f32 %v1956_v24, %v1203_v45  ;;  %v1204_v3 = vmul.f32 %v1949_v14, %v1184_v52 }
 0x36d   : > { %1603 = vrsqrt.f32 %v1155_v41  ;;  %v1156_v10 = vadd.f32 1e-05, %v1124_v63 }
 0x36e   : > { %v1239_v51 = vmax.f32 %v1223_v1, 0.0  ;;  %v1224_v4 = vadd.f32 %v1956_v24, %v1204_v3 }
 0x36f   : > { %v1600_v6 = vpop.eup %1599  ;;  %1605 = vrsqrt.f32 %v1156_v10 }
 0x370   : > { %1255 = vst.msk [vmem:[%s1969_s17 + $0x50] sm:$0xff] %vm522_vm1, %v1239_v51  ;;  %v1240_v55 = vmax.f32 %v1224_v4, 0.0  ;;  %v1185_v56 = vmul.f32 %v1600_v6, %v1137_v5 }
 0x371   : > { %v1602_v11 = vpop.eup %1601 }
 0x372   : > { %1256 = vst.msk [vmem:[%s1969_s17 + $0x58] sm:$0xff] %vm522_vm1, %v1240_v55  ;;  %v1205_v12 = vmul.f32 %v1949_v14, %v1185_v56  ;;  %v1186_v13 = vmul.f32 %v1602_v11, %v1138_v48 }
 0x374   : > { %v1225_v15 = vadd.f32 %v1956_v24, %v1205_v12  ;;  %v1206_v17 = vmul.f32 %v1949_v14, %v1186_v13 }
 0x376   : > { %v1241_v25 = vmax.f32 %v1225_v15, 0.0  ;;  %v1226_v20 = vadd.f32 %v1956_v24, %v1206_v17 }
 0x377   : > { %v1604_v21 = vpop.eup %1603 }
 0x378   : > { %1257 = vst.msk [vmem:[%s1969_s17 + $0x60] sm:$0xff] %vm522_vm1, %v1241_v25  ;;  %v1242_v19 = vmax.f32 %v1226_v20, 0.0  ;;  %v1187_v30 = vmul.f32 %v1604_v21, %v1139_v26 }
 0x379   : > { %v1606_v32 = vpop.eup %1605 }
 0x37a   : > { %1258 = vst.msk [vmem:[%s1969_s17 + $0x68] sm:$0xff] %vm522_vm1, %v1242_v19  ;;  %v1207_v33 = vmul.f32 %v1949_v14, %v1187_v30  ;;  %v1188_v34 = vmul.f32 %v1606_v32, %v1140_v27 }
 0x37c   : > { %v1227_v35 = vadd.f32 %v1956_v24, %v1207_v33  ;;  %v1208_v36 = vmul.f32 %v1949_v14, %v1188_v34 }
 0x37e   : > { %v1243_v0 = vmax.f32 %v1227_v35, 0.0  ;;  %v1228_v29 = vadd.f32 %v1956_v24, %v1208_v36 }
 0x380   : > { %1259 = vst.msk [vmem:[%s1969_s17 + $0x70] sm:$0xff] %vm522_vm1, %v1243_v0  ;;  %v1244_v7 = vmax.f32 %v1228_v29, 0.0 }
 0x382   : > { %1260 = vst.msk [vmem:[%s1969_s17 + $0x78] sm:$0xff] %vm522_vm1, %v1244_v7 }
 0x383 PF: > { %s16_s21 = sadd.s32 1, %s1613_s21  }
 0x384   : > { %p13_p4 = scmp.ge.s32.totalorder %s16_s21, 10  }
 0x386   :  { %15 = sbr.rel (!%p13_p4) target bundleno = 1 (0x1), region = 77 }

</bundles_post_ra>
